<compile_context>
chip_gen: v5e
topology: v5e:2x2
jax: 0.10.0
libtpu: 0.0.40
codegen_flags: <defaults>
</compile_context>

<pallas_src>
import jax
import jax.numpy as jnp
from jax.experimental import pallas as pl
from jax.experimental.pallas import tpu as pltpu


def _round_up(x, m):
    return (x + m - 1) // m * m


def _make_fp_kernel(C, S, tile_n, num_layers):
    # Static constants for the packed (distance, index) argmin key.
    idx_bits = max(1, (S - 1).bit_length())
    low_mask = (1 << idx_bits) - 1
    keep_mask_py = ~low_mask            # e.g. ...1111000 (as an int32 bit pattern)
    int_max = (1 << 31) - 1

    def kernel(xyz1_ref, xyz2t_ref, pts1_ref, pts2_ref, *rest):
        # rest = [W0a, W0b, b0, W1, b1, ..., W_{L-1}, b_{L-1}, out_ref]
        layer_refs = rest[:-1]
        out_ref = rest[-1]

        x1 = xyz1_ref[0].astype(jnp.float32)     # (TN, C)
        x2t = xyz2t_ref[0].astype(jnp.float32)   # (C, S)
        pts1 = pts1_ref[0].astype(jnp.float32)   # (TN, D1)
        pts2 = pts2_ref[0].astype(jnp.float32)   # (S, D2)

        # ---- squared distances (TN, S): pure VPU broadcast-FMA over the C (=3) coords.
        # The difference form keeps d >= 0 exactly, which the bit-packed key needs.
        d = None
        for c in range(C):
            diff = x1[:, c:c + 1] - x2t[c:c + 1, :]          # (TN,1) - (1,S) -> (TN,S)
            sq = diff * diff
            d = sq if d is None else d + sq

        # ---- top-3 nearest neighbours via a single packed int32 key per iteration.
        # key = (bits(d) with the low idx_bits of the mantissa cleared) | column index.
        # One jnp.min per iteration yields a unique, smallest-index tie-broken argmin.
        # The exact min distance is then recovered with a masked sum (exactly one
        # element is selected per row), so weights are full f32 precision.
        col_idx = jax.lax.broadcasted_iota(jnp.int32, (tile_n, S), 1)
        keep_mask = jnp.int32(keep_mask_py)
        keys = (pltpu.bitcast(d, jnp.int32) & keep_mask) | col_idx
        big = jnp.int32(int_max)

        wmat = jnp.zeros((tile_n, S), jnp.float32)
        norm = jnp.zeros((tile_n, 1), jnp.float32)
        for _ in range(3):
            mkey = jnp.min(keys, axis=-1, keepdims=True)                 # (TN, 1)
            sel = keys == mkey                                           # exactly one per row
            mval = jnp.sum(jnp.where(sel, d, 0.0), axis=-1, keepdims=True)  # exact dist
            w = 1.0 / (mval + 1e-8)
            wmat = wmat + jnp.where(sel, w, 0.0)
            norm = norm + w
            keys = jnp.where(sel, big, keys)

        # ---- interpolate (unnormalized) on the MXU, then rescale by 1/norm on the
        # narrow (TN, 1) axis instead of dividing the whole (TN, S) weight matrix.
        interp = jnp.dot(wmat, pts2, preferred_element_type=jnp.float32)  # (TN, D2)
        interp = interp * (1.0 / norm)

        # ---- pointwise MLP (Conv1d k=1 + eval BatchNorm + ReLU), BN folded on host.
        # Layer 0 weight is split so no [pts1, interp] concat is materialized.
        # TODO(synk): optionally cast MXU operands to bf16 on v6e/v7x after validating tolerance.
        w0a = layer_refs[0][...]    # (D1, out0)
        w0b = layer_refs[1][...]    # (D2, out0)
        b0 = layer_refs[2][...]     # (1, out0)
        h = (jnp.dot(pts1, w0a, preferred_element_type=jnp.float32)
             + jnp.dot(interp, w0b, preferred_element_type=jnp.float32)
             + b0)
        h = jnp.maximum(h, 0.0)
        for li in range(1, num_layers):
            wl = layer_refs[3 + 2 * (li - 1)][...]
            bl = layer_refs[3 + 2 * (li - 1) + 1][...]
            h = jnp.maximum(jnp.dot(h, wl, preferred_element_type=jnp.float32) + bl, 0.0)

        out_ref[0] = h.astype(out_ref.dtype)

    return kernel


def feature_propagation(xyz1, xyz2, points1, points2, params, *, tile_n=None):
    """params: list of dicts per MLP layer with keys:
       conv_w [out,in], conv_b [out], bn_gamma, bn_beta, bn_mean, bn_var (all [out])."""
    B, N, C = xyz1.shape
    _, S, _ = xyz2.shape
    D2 = points2.shape[-1]

    if S == 1:
        # TODO(synk): S == 1 branch is a pure broadcast of points2; handled outside the kernel.
        raise NotImplementedError("S == 1 broadcast path not exercised here")
    if points1 is None:
        # TODO(synk): points1=None path (no concat) not exercised here.
        raise NotImplementedError("points1=None path not exercised here")
    D1 = points1.shape[-1]

    # ---- fold Conv1d(k=1) bias + BatchNorm1d (eval) into the weights/bias ----
    eps = 1e-5
    folded = []
    for p in params:
        scale = p["bn_gamma"] / jnp.sqrt(p["bn_var"] + eps)                   # [out]
        bias = (p["conv_b"] - p["bn_mean"]) * scale + p["bn_beta"]            # [out]
        Wf = (p["conv_w"].T * scale[None, :]).astype(jnp.float32)             # [in, out]
        folded.append([Wf, bias.astype(jnp.float32)])

    num_layers = len(folded)
    out_ch = folded[-1][0].shape[1]
    out_pad = _round_up(out_ch, 128)
    if out_pad != out_ch:
        # Lane-dense output store: pad last layer (zero cols -> ReLU(0)=0), slice below.
        Wl, bl = folded[-1]
        folded[-1] = [jnp.pad(Wl, ((0, 0), (0, out_pad - out_ch))),
                      jnp.pad(bl, ((0, out_pad - out_ch),))]

    # Split the first layer's weight to avoid concatenating [points1, interp].
    W0, b0 = folded[0]
    layer_args = [W0[:D1], W0[D1:], b0[None, :]]
    for Wl, bl in folded[1:]:
        layer_args += [Wl, bl[None, :]]

    # ---- N tiling ----
    if tile_n is None:
        if N <= 256:
            tile_n = N
        else:
            tile_n = 256
            # keep ~6 live (tile_n, S) f32 temporaries within a modest VMEM budget
            while tile_n > 128 and 6 * tile_n * S * 4 > (12 << 20):
                tile_n //= 2
    grid = (B, pl.cdiv(N, tile_n))

    xyz2t = jnp.transpose(xyz2, (0, 2, 1))   # (B, C, S): coords on sublanes, S on lanes

    in_specs = [
        pl.BlockSpec((1, tile_n, C), lambda b, n: (b, n, 0)),   # xyz1 tile
        pl.BlockSpec((1, C, S), lambda b, n: (b, 0, 0)),        # xyz2^T  (resident)
        pl.BlockSpec((1, tile_n, D1), lambda b, n: (b, n, 0)),  # points1 tile
        pl.BlockSpec((1, S, D2), lambda b, n: (b, 0, 0)),       # points2 (resident)
    ]
    for arg in layer_args:
        in_specs.append(pl.BlockSpec(arg.shape, lambda b, n: (0, 0)))

    # ---- VMEM budget: only raise the scoped limit if the estimate needs it ----
    block_bytes = 4 * (2 * tile_n * (C + D1 + out_pad) + C * S + S * D2)
    temp_bytes = 4 * 6 * tile_n * S
    weight_bytes = sum(int(a.size) * 4 for a in layer_args)
    need = 2 * block_bytes + temp_bytes + weight_bytes
    vmem_limit = None
    if need > (14 << 20):
        vmem_limit = min(_round_up(2 * need, 1 << 20), 96 * 1024 * 1024)

    # ---- advisory cost estimate ----
    mlp_flops = 2 * N * (D1 + D2) * folded[0][0].shape[1]
    prev = folded[0][0].shape[1]
    for Wl, _ in folded[1:]:
        mlp_flops += 2 * N * prev * Wl.shape[1]
        prev = Wl.shape[1]
    flops = int(B * (3 * N * S * C + 6 * N * S + 2 * N * S * D2 + mlp_flops))
    bytes_accessed = int(
        4 * (xyz1.size + xyz2t.size + points1.size + points2.size + B * N * out_pad)
        + weight_bytes)

    kernel = _make_fp_kernel(C, S, tile_n, num_layers)
    fn = pl.pallas_call(
        kernel,
        out_shape=jax.ShapeDtypeStruct((B, N, out_pad), jnp.float32),
        grid=grid,
        in_specs=in_specs,
        out_specs=pl.BlockSpec((1, tile_n, out_pad), lambda b, n: (b, n, 0)),
        compiler_params=pltpu.CompilerParams(
            dimension_semantics=("parallel", "parallel"),
            vmem_limit_bytes=vmem_limit),
        cost_estimate=pl.CostEstimate(flops=flops, transcendentals=0,
                                      bytes_accessed=bytes_accessed),
    )
    out = fn(xyz1, xyz2t, points1, points2, *layer_args)
    return out[..., :out_ch] if out_pad != out_ch else out


# ---------------- pure-JAX reference (mirrors the PyTorch forward) ----------------
def feature_propagation_ref(xyz1, xyz2, points1, points2, params):
    d = (-2.0 * jnp.einsum("bnc,bmc->bnm", xyz1, xyz2)
         + jnp.sum(xyz1 ** 2, -1)[:, :, None]
         + jnp.sum(xyz2 ** 2, -1)[:, None, :])
    idx = jnp.argsort(d, axis=-1)[:, :, :3]
    dsort = jnp.sort(d, axis=-1)[:, :, :3]
    recip = 1.0 / (dsort + 1e-8)
    weight = recip / jnp.sum(recip, axis=2, keepdims=True)
    gathered = jax.vmap(lambda pts, i: pts[i])(points2, idx)          # [B,N,3,D2]
    interp = jnp.sum(gathered * weight[..., None], axis=2)            # [B,N,D2]
    h = jnp.concatenate([points1, interp], axis=-1)
    eps = 1e-5
    for p in params:
        z = jnp.einsum("bnc,oc->bno", h, p["conv_w"]) + p["conv_b"]
        z = (z - p["bn_mean"]) / jnp.sqrt(p["bn_var"] + eps) * p["bn_gamma"] + p["bn_beta"]
        h = jnp.maximum(z, 0.0)
    return h


if __name__ == "__main__":
    key = jax.random.PRNGKey(0)
    B, N, S, C = 2, 16, 8, 3
    D1, D2 = 16, 16
    in_channel = D1 + D2
    mlp = [32, 16]

    k1, k2, k3, k4, kw = jax.random.split(key, 5)
    xyz1 = jax.random.normal(k1, (B, N, C), jnp.float32)
    xyz2 = jax.random.normal(k2, (B, S, C), jnp.float32)
    points1 = jax.random.normal(k3, (B, N, D1), jnp.float32)
    points2 = jax.random.normal(k4, (B, S, D2), jnp.float32)

    # Deterministic parameter init (Conv1d k=1 weights + eval-mode BatchNorm stats).
    params = []
    last = in_channel
    wkeys = jax.random.split(kw, len(mlp))
    for li, out_ch in enumerate(mlp):
        params.append(dict(
            conv_w=0.1 * jax.random.normal(wkeys[li], (out_ch, last), jnp.float32),
            conv_b=0.01 * jnp.arange(out_ch, dtype=jnp.float32),
            bn_gamma=1.0 + 0.1 * jnp.arange(out_ch, dtype=jnp.float32),
            bn_beta=0.05 * jnp.arange(out_ch, dtype=jnp.float32),
            bn_mean=0.01 * jnp.arange(out_ch, dtype=jnp.float32),
            bn_var=1.0 + 0.02 * jnp.arange(out_ch, dtype=jnp.float32),
        ))
        last = out_ch

    out = feature_propagation(xyz1, xyz2, points1, points2, params)
    out = jax.block_until_ready(out)

    ref = feature_propagation_ref(xyz1, xyz2, points1, points2, params)
    assert out.shape == (B, N, mlp[-1]), out.shape
    assert jnp.allclose(out, ref, atol=1e-4, rtol=1e-4), float(jnp.max(jnp.abs(out - ref)))

    print("KERNEL_OK")
</pallas_src>

<mosaic_0001>
module attributes {stable_mosaic.version = 11 : i64} {
  func.func @kernel(%arg0: i32, %arg1: i32, %arg2: memref<1x16x3xf32, #tpu.memory_space<vmem>>, %arg3: memref<1x3x8xf32, #tpu.memory_space<vmem>>, %arg4: memref<1x16x16xf32, #tpu.memory_space<vmem>>, %arg5: memref<1x8x16xf32, #tpu.memory_space<vmem>>, %arg6: memref<16x32xf32, #tpu.memory_space<vmem>>, %arg7: memref<16x32xf32, #tpu.memory_space<vmem>>, %arg8: memref<1x32xf32, #tpu.memory_space<vmem>>, %arg9: memref<32x128xf32, #tpu.memory_space<vmem>>, %arg10: memref<1x128xf32, #tpu.memory_space<vmem>>, %arg11: memref<1x16x128xf32, #tpu.memory_space<vmem>>) attributes {dimension_semantics = [#tpu.dimension_semantics<parallel>, #tpu.dimension_semantics<parallel>], iteration_bounds = array<i64: 2, 1>, scalar_prefetch = 0 : i64, scratch_operands = 0 : i64, tpu.core_type = #tpu.core_type<tc>, window_params = [{transform_indices = @transform_0, window_bounds = array<i64: 1, 16, 3>}, {transform_indices = @transform_1, window_bounds = array<i64: 1, 3, 8>}, {transform_indices = @transform_2, window_bounds = array<i64: 1, 16, 16>}, {transform_indices = @transform_3, window_bounds = array<i64: 1, 8, 16>}, {pipeline_mode = #tpu.pipeline_mode<synchronous>, transform_indices = @transform_4, window_bounds = array<i64: 16, 32>}, {pipeline_mode = #tpu.pipeline_mode<synchronous>, transform_indices = @transform_5, window_bounds = array<i64: 16, 32>}, {pipeline_mode = #tpu.pipeline_mode<synchronous>, transform_indices = @transform_6, window_bounds = array<i64: 1, 32>}, {pipeline_mode = #tpu.pipeline_mode<synchronous>, transform_indices = @transform_7, window_bounds = array<i64: 32, 128>}, {pipeline_mode = #tpu.pipeline_mode<synchronous>, transform_indices = @transform_8, window_bounds = array<i64: 1, 128>}, {transform_indices = @transform_9, window_bounds = array<i64: 1, 16, 128>}]} {
    %c0 = arith.constant 0 : index
    %c0_0 = arith.constant 0 : index
    %c0_1 = arith.constant 0 : index
    %0 = vector.load %arg2[%c0, %c0_0, %c0_1] : memref<1x16x3xf32, #tpu.memory_space<vmem>>, vector<1x16x3xf32>
    %1 = vector.shape_cast %0 : vector<1x16x3xf32> to vector<16x3xf32>
    %c0_2 = arith.constant 0 : index
    %c0_3 = arith.constant 0 : index
    %c0_4 = arith.constant 0 : index
    %2 = vector.load %arg3[%c0_2, %c0_3, %c0_4] : memref<1x3x8xf32, #tpu.memory_space<vmem>>, vector<1x3x8xf32>
    %3 = vector.shape_cast %2 : vector<1x3x8xf32> to vector<3x8xf32>
    %c0_5 = arith.constant 0 : index
    %c0_6 = arith.constant 0 : index
    %c0_7 = arith.constant 0 : index
    %4 = vector.load %arg4[%c0_5, %c0_6, %c0_7] : memref<1x16x16xf32, #tpu.memory_space<vmem>>, vector<1x16x16xf32>
    %5 = vector.shape_cast %4 : vector<1x16x16xf32> to vector<16x16xf32>
    %c0_8 = arith.constant 0 : index
    %c0_9 = arith.constant 0 : index
    %c0_10 = arith.constant 0 : index
    %6 = vector.load %arg5[%c0_8, %c0_9, %c0_10] : memref<1x8x16xf32, #tpu.memory_space<vmem>>, vector<1x8x16xf32>
    %7 = vector.shape_cast %6 : vector<1x8x16xf32> to vector<8x16xf32>
    %8 = vector.extract_strided_slice %1 {offsets = [0, 0], sizes = [16, 1], strides = [1, 1]} : vector<16x3xf32> to vector<16x1xf32>
    %9 = vector.extract_strided_slice %3 {offsets = [0, 0], sizes = [1, 8], strides = [1, 1]} : vector<3x8xf32> to vector<1x8xf32>
    %10 = vector.broadcast %8 : vector<16x1xf32> to vector<16x8xf32>
    %11 = vector.broadcast %9 : vector<1x8xf32> to vector<16x8xf32>
    %12 = arith.subf %10, %11 : vector<16x8xf32>
    %13 = arith.mulf %12, %12 : vector<16x8xf32>
    %14 = vector.extract_strided_slice %1 {offsets = [0, 1], sizes = [16, 1], strides = [1, 1]} : vector<16x3xf32> to vector<16x1xf32>
    %15 = vector.extract_strided_slice %3 {offsets = [1, 0], sizes = [1, 8], strides = [1, 1]} : vector<3x8xf32> to vector<1x8xf32>
    %16 = vector.broadcast %14 : vector<16x1xf32> to vector<16x8xf32>
    %17 = vector.broadcast %15 : vector<1x8xf32> to vector<16x8xf32>
    %18 = arith.subf %16, %17 : vector<16x8xf32>
    %19 = arith.mulf %18, %18 : vector<16x8xf32>
    %20 = arith.addf %13, %19 : vector<16x8xf32>
    %21 = vector.extract_strided_slice %1 {offsets = [0, 2], sizes = [16, 1], strides = [1, 1]} : vector<16x3xf32> to vector<16x1xf32>
    %22 = vector.extract_strided_slice %3 {offsets = [2, 0], sizes = [1, 8], strides = [1, 1]} : vector<3x8xf32> to vector<1x8xf32>
    %23 = vector.broadcast %21 : vector<16x1xf32> to vector<16x8xf32>
    %24 = vector.broadcast %22 : vector<1x8xf32> to vector<16x8xf32>
    %25 = arith.subf %23, %24 : vector<16x8xf32>
    %26 = arith.mulf %25, %25 : vector<16x8xf32>
    %27 = arith.addf %20, %26 : vector<16x8xf32>
    %28 = tpu.iota {dimensions = array<i32: 1>} : vector<16x8xi32>
    %29 = tpu.bitcast %27 : vector<16x8xf32> -> vector<16x8xi32>
    %c-8_i32 = arith.constant -8 : i32
    %30 = vector.broadcast %c-8_i32 : i32 to vector<16x8xi32>
    %31 = arith.andi %29, %30 : vector<16x8xi32>
    %32 = arith.ori %31, %28 : vector<16x8xi32>
    %cst = arith.constant 0.000000e+00 : f32
    %33 = vector.broadcast %cst : f32 to vector<16x8xf32>
    %cst_11 = arith.constant 0.000000e+00 : f32
    %34 = vector.broadcast %cst_11 : f32 to vector<16x1xf32>
    %cst_12 = arith.constant dense<2147483647> : vector<16xi32>
    %35 = vector.multi_reduction <minsi>, %32, %cst_12 [1] : vector<16x8xi32> to vector<16xi32>
    %36 = vector.shape_cast %35 : vector<16xi32> to vector<16x1xi32>
    %37 = vector.broadcast %36 : vector<16x1xi32> to vector<16x8xi32>
    %38 = arith.cmpi eq, %32, %37 : vector<16x8xi32>
    %cst_13 = arith.constant 0.000000e+00 : f32
    %39 = vector.broadcast %cst_13 : f32 to vector<16x8xf32>
    %40 = arith.select %38, %27, %39 : vector<16x8xi1>, vector<16x8xf32>
    %cst_14 = arith.constant dense<0.000000e+00> : vector<16xf32>
    %41 = vector.multi_reduction <add>, %40, %cst_14 [1] : vector<16x8xf32> to vector<16xf32>
    %42 = vector.shape_cast %41 : vector<16xf32> to vector<16x1xf32>
    %cst_15 = arith.constant 9.99999993E-9 : f32
    %43 = vector.broadcast %cst_15 : f32 to vector<16x1xf32>
    %44 = arith.addf %42, %43 : vector<16x1xf32>
    %cst_16 = arith.constant 1.000000e+00 : f32
    %45 = vector.broadcast %cst_16 : f32 to vector<16x1xf32>
    %46 = arith.divf %45, %44 : vector<16x1xf32>
    %cst_17 = arith.constant 0.000000e+00 : f32
    %47 = vector.shape_cast %46 : vector<16x1xf32> to vector<16x1xf32>
    %48 = vector.broadcast %47 : vector<16x1xf32> to vector<16x8xf32>
    %49 = vector.broadcast %cst_17 : f32 to vector<16x8xf32>
    %50 = arith.select %38, %48, %49 : vector<16x8xi1>, vector<16x8xf32>
    %51 = arith.addf %33, %50 : vector<16x8xf32>
    %52 = arith.addf %34, %46 : vector<16x1xf32>
    %c2147483647_i32 = arith.constant 2147483647 : i32
    %53 = vector.broadcast %c2147483647_i32 : i32 to vector<16x8xi32>
    %54 = arith.select %38, %53, %32 : vector<16x8xi1>, vector<16x8xi32>
    %cst_18 = arith.constant dense<2147483647> : vector<16xi32>
    %55 = vector.multi_reduction <minsi>, %54, %cst_18 [1] : vector<16x8xi32> to vector<16xi32>
    %56 = vector.shape_cast %55 : vector<16xi32> to vector<16x1xi32>
    %57 = vector.broadcast %56 : vector<16x1xi32> to vector<16x8xi32>
    %58 = arith.cmpi eq, %54, %57 : vector<16x8xi32>
    %cst_19 = arith.constant 0.000000e+00 : f32
    %59 = vector.broadcast %cst_19 : f32 to vector<16x8xf32>
    %60 = arith.select %58, %27, %59 : vector<16x8xi1>, vector<16x8xf32>
    %cst_20 = arith.constant dense<0.000000e+00> : vector<16xf32>
    %61 = vector.multi_reduction <add>, %60, %cst_20 [1] : vector<16x8xf32> to vector<16xf32>
    %62 = vector.shape_cast %61 : vector<16xf32> to vector<16x1xf32>
    %cst_21 = arith.constant 9.99999993E-9 : f32
    %63 = vector.broadcast %cst_21 : f32 to vector<16x1xf32>
    %64 = arith.addf %62, %63 : vector<16x1xf32>
    %cst_22 = arith.constant 1.000000e+00 : f32
    %65 = vector.broadcast %cst_22 : f32 to vector<16x1xf32>
    %66 = arith.divf %65, %64 : vector<16x1xf32>
    %cst_23 = arith.constant 0.000000e+00 : f32
    %67 = vector.shape_cast %66 : vector<16x1xf32> to vector<16x1xf32>
    %68 = vector.broadcast %67 : vector<16x1xf32> to vector<16x8xf32>
    %69 = vector.broadcast %cst_23 : f32 to vector<16x8xf32>
    %70 = arith.select %58, %68, %69 : vector<16x8xi1>, vector<16x8xf32>
    %71 = arith.addf %51, %70 : vector<16x8xf32>
    %72 = arith.addf %52, %66 : vector<16x1xf32>
    %c2147483647_i32_24 = arith.constant 2147483647 : i32
    %73 = vector.broadcast %c2147483647_i32_24 : i32 to vector<16x8xi32>
    %74 = arith.select %58, %73, %54 : vector<16x8xi1>, vector<16x8xi32>
    %cst_25 = arith.constant dense<2147483647> : vector<16xi32>
    %75 = vector.multi_reduction <minsi>, %74, %cst_25 [1] : vector<16x8xi32> to vector<16xi32>
    %76 = vector.shape_cast %75 : vector<16xi32> to vector<16x1xi32>
    %77 = vector.broadcast %76 : vector<16x1xi32> to vector<16x8xi32>
    %78 = arith.cmpi eq, %74, %77 : vector<16x8xi32>
    %cst_26 = arith.constant 0.000000e+00 : f32
    %79 = vector.broadcast %cst_26 : f32 to vector<16x8xf32>
    %80 = arith.select %78, %27, %79 : vector<16x8xi1>, vector<16x8xf32>
    %cst_27 = arith.constant dense<0.000000e+00> : vector<16xf32>
    %81 = vector.multi_reduction <add>, %80, %cst_27 [1] : vector<16x8xf32> to vector<16xf32>
    %82 = vector.shape_cast %81 : vector<16xf32> to vector<16x1xf32>
    %cst_28 = arith.constant 9.99999993E-9 : f32
    %83 = vector.broadcast %cst_28 : f32 to vector<16x1xf32>
    %84 = arith.addf %82, %83 : vector<16x1xf32>
    %cst_29 = arith.constant 1.000000e+00 : f32
    %85 = vector.broadcast %cst_29 : f32 to vector<16x1xf32>
    %86 = arith.divf %85, %84 : vector<16x1xf32>
    %cst_30 = arith.constant 0.000000e+00 : f32
    %87 = vector.shape_cast %86 : vector<16x1xf32> to vector<16x1xf32>
    %88 = vector.broadcast %87 : vector<16x1xf32> to vector<16x8xf32>
    %89 = vector.broadcast %cst_30 : f32 to vector<16x8xf32>
    %90 = arith.select %78, %88, %89 : vector<16x8xi1>, vector<16x8xf32>
    %91 = arith.addf %71, %90 : vector<16x8xf32>
    %92 = arith.addf %72, %86 : vector<16x1xf32>
    %cst_31 = arith.constant dense<0.000000e+00> : vector<16x16xf32>
    %93 = tpu.matmul %91, %7, %cst_31 {dimension_numbers = #tpu.dot_dimension_numbers<[1], [0], [0], [1], [0, 0, 1, 1], [], []>} : vector<16x8xf32>, vector<8x16xf32>, vector<16x16xf32> -> vector<16x16xf32>
    %cst_32 = arith.constant 1.000000e+00 : f32
    %94 = vector.broadcast %cst_32 : f32 to vector<16x1xf32>
    %95 = arith.divf %94, %92 : vector<16x1xf32>
    %96 = vector.broadcast %95 : vector<16x1xf32> to vector<16x16xf32>
    %97 = arith.mulf %93, %96 : vector<16x16xf32>
    %c0_33 = arith.constant 0 : index
    %c0_34 = arith.constant 0 : index
    %98 = vector.load %arg6[%c0_33, %c0_34] : memref<16x32xf32, #tpu.memory_space<vmem>>, vector<16x32xf32>
    %c0_35 = arith.constant 0 : index
    %c0_36 = arith.constant 0 : index
    %99 = vector.load %arg7[%c0_35, %c0_36] : memref<16x32xf32, #tpu.memory_space<vmem>>, vector<16x32xf32>
    %c0_37 = arith.constant 0 : index
    %c0_38 = arith.constant 0 : index
    %100 = vector.load %arg8[%c0_37, %c0_38] : memref<1x32xf32, #tpu.memory_space<vmem>>, vector<1x32xf32>
    %cst_39 = arith.constant dense<0.000000e+00> : vector<16x32xf32>
    %101 = tpu.matmul %5, %98, %cst_39 {dimension_numbers = #tpu.dot_dimension_numbers<[1], [0], [0], [1], [0, 0, 1, 1], [], []>} : vector<16x16xf32>, vector<16x32xf32>, vector<16x32xf32> -> vector<16x32xf32>
    %cst_40 = arith.constant dense<0.000000e+00> : vector<16x32xf32>
    %102 = tpu.matmul %97, %99, %cst_40 {dimension_numbers = #tpu.dot_dimension_numbers<[1], [0], [0], [1], [0, 0, 1, 1], [], []>} : vector<16x16xf32>, vector<16x32xf32>, vector<16x32xf32> -> vector<16x32xf32>
    %103 = arith.addf %101, %102 : vector<16x32xf32>
    %104 = vector.broadcast %100 : vector<1x32xf32> to vector<16x32xf32>
    %105 = arith.addf %103, %104 : vector<16x32xf32>
    %cst_41 = arith.constant 0.000000e+00 : f32
    %106 = vector.broadcast %cst_41 : f32 to vector<16x32xf32>
    %107 = arith.maximumf %105, %106 : vector<16x32xf32>
    %c0_42 = arith.constant 0 : index
    %c0_43 = arith.constant 0 : index
    %108 = vector.load %arg9[%c0_42, %c0_43] : memref<32x128xf32, #tpu.memory_space<vmem>>, vector<32x128xf32>
    %c0_44 = arith.constant 0 : index
    %c0_45 = arith.constant 0 : index
    %109 = vector.load %arg10[%c0_44, %c0_45] : memref<1x128xf32, #tpu.memory_space<vmem>>, vector<1x128xf32>
    %cst_46 = arith.constant dense<0.000000e+00> : vector<16x128xf32>
    %110 = tpu.matmul %107, %108, %cst_46 {dimension_numbers = #tpu.dot_dimension_numbers<[1], [0], [0], [1], [0, 0, 1, 1], [], []>} : vector<16x32xf32>, vector<32x128xf32>, vector<16x128xf32> -> vector<16x128xf32>
    %111 = vector.broadcast %109 : vector<1x128xf32> to vector<16x128xf32>
    %112 = arith.addf %110, %111 : vector<16x128xf32>
    %cst_47 = arith.constant 0.000000e+00 : f32
    %113 = vector.broadcast %cst_47 : f32 to vector<16x128xf32>
    %114 = arith.maximumf %112, %113 : vector<16x128xf32>
    %c0_48 = arith.constant 0 : index
    %c0_49 = arith.constant 0 : index
    %c0_50 = arith.constant 0 : index
    %115 = vector.load %arg11[%c0_48, %c0_49, %c0_50] : memref<1x16x128xf32, #tpu.memory_space<vmem>>, vector<1x16x128xf32>
    %116 = vector.shape_cast %115 : vector<1x16x128xf32> to vector<16x128xf32>
    %117 = vector.shape_cast %114 : vector<16x128xf32> to vector<1x16x128xf32>
    tpu.vector_store %arg11[%c0_48, %c0_49, %c0_50], %117 {strides = array<i32>} : memref<1x16x128xf32, #tpu.memory_space<vmem>>, vector<1x16x128xf32>,
    return
  }
  func.func @transform_0(%arg0: i32, %arg1: i32) -> (i32, i32, i32) {
    %c0_i32 = arith.constant 0 : i32
    %c0_i32_0 = arith.constant 0 : i32
    return %arg0, %arg1, %c0_i32 : i32, i32, i32
  }
  func.func @transform_1(%arg0: i32, %arg1: i32) -> (i32, i32, i32) {
    %c0_i32 = arith.constant 0 : i32
    %c0_i32_0 = arith.constant 0 : i32
    %c0_i32_1 = arith.constant 0 : i32
    return %arg0, %c0_i32, %c0_i32_0 : i32, i32, i32
  }
  func.func @transform_2(%arg0: i32, %arg1: i32) -> (i32, i32, i32) {
    %c0_i32 = arith.constant 0 : i32
    %c0_i32_0 = arith.constant 0 : i32
    return %arg0, %arg1, %c0_i32 : i32, i32, i32
  }
  func.func @transform_3(%arg0: i32, %arg1: i32) -> (i32, i32, i32) {
    %c0_i32 = arith.constant 0 : i32
    %c0_i32_0 = arith.constant 0 : i32
    %c0_i32_1 = arith.constant 0 : i32
    return %arg0, %c0_i32, %c0_i32_0 : i32, i32, i32
  }
  func.func @transform_4(%arg0: i32, %arg1: i32) -> (i32, i32) {
    %c0_i32 = arith.constant 0 : i32
    %c0_i32_0 = arith.constant 0 : i32
    %c0_i32_1 = arith.constant 0 : i32
    return %c0_i32, %c0_i32_0 : i32, i32
  }
  func.func @transform_5(%arg0: i32, %arg1: i32) -> (i32, i32) {
    %c0_i32 = arith.constant 0 : i32
    %c0_i32_0 = arith.constant 0 : i32
    %c0_i32_1 = arith.constant 0 : i32
    return %c0_i32, %c0_i32_0 : i32, i32
  }
  func.func @transform_6(%arg0: i32, %arg1: i32) -> (i32, i32) {
    %c0_i32 = arith.constant 0 : i32
    %c0_i32_0 = arith.constant 0 : i32
    %c0_i32_1 = arith.constant 0 : i32
    return %c0_i32, %c0_i32_0 : i32, i32
  }
  func.func @transform_7(%arg0: i32, %arg1: i32) -> (i32, i32) {
    %c0_i32 = arith.constant 0 : i32
    %c0_i32_0 = arith.constant 0 : i32
    %c0_i32_1 = arith.constant 0 : i32
    return %c0_i32, %c0_i32_0 : i32, i32
  }
  func.func @transform_8(%arg0: i32, %arg1: i32) -> (i32, i32) {
    %c0_i32 = arith.constant 0 : i32
    %c0_i32_0 = arith.constant 0 : i32
    %c0_i32_1 = arith.constant 0 : i32
    return %c0_i32, %c0_i32_0 : i32, i32
  }
  func.func @transform_9(%arg0: i32, %arg1: i32) -> (i32, i32, i32) {
    %c0_i32 = arith.constant 0 : i32
    %c0_i32_0 = arith.constant 0 : i32
    return %arg0, %arg1, %c0_i32 : i32, i32, i32
  }
}

</mosaic_0001>

<bundles_post_ra>
// kernel: tpu_custom_call.1
= control target key start
LH: loop header
LB: loop body
LE: loop exit
PB: predicated region body
PF: predicated region fallthrough
CT: control target
= control target key end

     0   :  { %s1876_s0 = inlined_call_operand.vmem [shape: f32[2,16,3], index: 0, kind: input, shape index: {}]   ;;  %s1877_s1 = inlined_call_operand.vmem [shape: f32[2,3,8], index: 1, kind: input, shape index: {}]   ;;  %s1878_s2 = inlined_call_operand.vmem [shape: f32[2,16,16], index: 2, kind: input, shape index: {}]   ;;  %s1879_s3 = inlined_call_operand.vmem [shape: f32[2,8,16], index: 3, kind: input, shape index: {}]   ;;  %s1880_s4 = inlined_call_operand.hbm [shape: f32[16,32], index: 4, kind: input, shape index: {}]   ;;  %s1881_s5 = inlined_call_operand.hbm [shape: f32[16,32], index: 5, kind: input, shape index: {}]   ;;  %s1882_s6 = inlined_call_operand.vmem [shape: f32[1,32], index: 6, kind: input, shape index: {}]   ;;  %s1883_s7 = inlined_call_operand.hbm [shape: f32[32,128], index: 7, kind: input, shape index: {}]   ;;  %s1884_s8 = inlined_call_operand.vmem [shape: f32[1,128], index: 8, kind: input, shape index: {}]   ;;  %s1885_s9 = inlined_call_operand.hbm [shape: f32[2,16,128], index: 9, kind: output, shape index: {}]  }
   0x1   :  { %1890 = sst [smem:[#allocation17_spill]] %s1881_s5 }
   0x2   :  { %14 = vsyncpa [#allocation3], 0 }
   0x3   :  { %15 = vsyncpa [#allocation6], 0 }
   0x4   :  { %16 = vsyncpa [#allocation4], 0 }
   0x5   :  { %18 = vsyncpa [#allocation4 + $0x1], 0  ;;  %s1514_s30 = smov 0   ;;  %s1516_s10 = smov 0  }
   0x6   :  { %s1518_s11 = smov 0   ;;  %s1520_s12 = smov 0  }
   0x7   :  { %s1522_s13 = smov 0   ;;  %s1524_s14 = smov 0  }
   0x8 LB: > { %1891 = sst [smem:[#allocation12_spill]] %s1440_s11  ;;  %s1124_s15 = sadd.s32 4294967295, %s1452_s14   ;;  %s1452_s14 = sphi %s1524_s14, %s24_s14   ;;  %s1448_s13 = sphi %s1522_s13, %s1912_s13   ;;  %s1444_s12 = sphi %s1520_s12, %s1911_s12   ;;  %s1440_s11 = sphi %s1518_s11, %s1910_s11   ;;  %s1436_s10 = sphi %s1516_s10, %s1914_s10   ;;  %s1432_s30 = sphi %s1514_s30, %s1913_s30  }
   0x9   : > { %1892 = sst [smem:[#allocation13_spill]] %s1448_s13  ;;  %s1125_s16 = sadd.s32 4294967294, %s1452_s14  }
   0xa   : > { %s36_s17 = sadd.s32 1, %s1448_s13  ;;  %s258_s18 = sadd.s32 1, %s1440_s11 }
   0xb   : > { %p38_p0 = scmp.ge.s32.totalorder %s36_s17, 2  ;;  %p268_p1 = scmp.ne.s32.totalorder %s1440_s11, %s1436_s10 }
   0xc   : > { %p269_p2 = scmp.eq.s32.totalorder %s1124_s15, 1  ;;  %p274_p3 = scmp.ne.s32.totalorder %s1436_s10, %s1432_s30 }
   0xd   : > { %s1916_s17 = smov (%p38_p0, %s36_s17), 0  ;;  %p275_p5 = scmp.eq.s32.totalorder %s1125_s16, 1 }
   0xe   : > { %1893 = sst [smem:[#allocation14_spill]] %s1916_s17  ;;  %p1554_p4 = por %p269_p2, %p268_p1 }
   0xf   : > { %s253_s20 = ssub.s32 %s1448_s13, %s1916_s17  ;;  %p1126_p6 = scmp.ge.s32.totalorder %s1452_s14, 1 }
  0x10   : > { %p256_p7 = scmp.eq.s32.totalorder %s253_s20, 0  ;;  %p1561_p8 = por %p275_p5, %p274_p3 }
  0x11   : > { %p282_p9 = scmp.lt.s32.totalorder %s1452_s14, 3  ;;  %p1573_p11 = scmp.eq.s32.totalorder %s1124_s15, 0 }
  0x12   : > { %s1895_s21 = scalar_select %p1561_p8, 1, 0 }
  0x13   : > { %s1567_s22 = scalar_select %p256_p7, %s1440_s11, %s258_s18  }
  0x14   : > { %1896 = sst [smem:[#allocation15_spill]] %s1895_s21  ;;  %p1569_p10 = pnand %p1126_p6, %p282_p9 }
  0x15   : > { %1897 = sst [smem:[#allocation16_spill]] %s1567_s22  ;;  %s1454_s29 = smov [#allocation5]  }
  0x16   : > { %p1172_p12 = pneg %p1569_p10  ;;  %s1900_s5 = sld [smem:[#allocation17_spill]] }
  0x17   : > { %s309_s15 = sshll.u32 %s1454_s29, 4  ;;  %s1455_s16 = smov 128   ;;  %s310_s15 = int_to_ptr.vmem [resolvable:$true] %s309_s15 }
  0x18   : > { %p1584_p13 = pnand %p1573_p11, %p1172_p12  ;;  %s1456_s18 = smov 8  }
  0x19   : > { %s293_s25 = sshll.u32 %s1880_s4, 4  ;;  %s1457_s26 = smov [#allocation2]   ;;  %s294_s25 = int_to_ptr.hbm [resolvable:$true] %s293_s25 }
  0x1a   : > { %s324_s11 = sshll.u32 %s1883_s7, 4  ;;  %s1458_s29 = smov [#allocation7]   ;;  %s325_s11 = int_to_ptr.hbm [resolvable:$true] %s324_s11 }
  0x1b   : > { %s326_s21 = sshll.u32 %s1458_s29, 4  ;;  %385 = sbr.rel (%p1569_p10) target bundleno = 1460 (0x5b4), region = 56  ;;  %s327_s21 = int_to_ptr.vmem [resolvable:$true] %s326_s21 }
  0x1c   : > { %s307_s27 = sshll.u32 %s1900_s5, 4  ;;  %s295_s5 = sshll.u32 %s1457_s26, 4  ;;  %s308_s27 = int_to_ptr.hbm [resolvable:$true] %s307_s27  ;;  %s296_s5 = int_to_ptr.vmem [resolvable:$true] %s295_s5 }
  0x1d   : > { %1178 = dma.hbm_to_vmem [thread:$0]  (!%p1584_p13), %s308_s27, 256, %s310_s15, [#allocation6], %s1455_s16, %s1455_s16, %s1456_s18  }
  0x1e   : > { %1175 = dma.hbm_to_vmem [thread:$0]  (!%p1584_p13), %s294_s25, 256, %s296_s5, [#allocation3], %s1455_s16, %s1455_s16, %s1456_s18  }
  0x1f   : > { %1181 = dma.hbm_to_vmem [thread:$0]  (!%p1584_p13), %s325_s11, 512, %s327_s21, [#allocation6], %s1455_s16, %s1455_s16, %s1456_s18  }
  0x20   : > { %1419 = dma.done.wait (%p1573_p11), [#allocation3], 256  }
  0x21   : > { %1421 = vsyncadd (%p1573_p11), [#allocation3], 4294967040 }
  0x22   : > { %1423 = dma.done.wait (%p1573_p11), [#allocation6], 768  }
  0x23   : > { %1425 = vsyncadd (%p1573_p11), [#allocation6], 4294966528  ;;  %p454_p0 = scmp.lt.s32.totalorder %s1444_s12, 1  ;;  %v1459_v0 = vmov 2   ;;  %v1460_v1 = vmov 0   ;;  %v1461_v2 = vmov 1   ;;  %v533_v22 = vlaneseq }
  0x24   : > { %1253 = vset.pattern.permute.xlu1 %v1459_v0  ;;  %1251 = vset.pattern.permute.xlu0 %v1460_v1  ;;  %vm541_vm0 = vcmask 64512   ;;  %vm846_vm13 = vcmask 130048   ;;  %s1386_s29 = scalar_lea.hbm %s1885_s9, 32 }
  0x25   : > { %s1612_s5 = scalar_select %p454_p0, %s1444_s12, 1  ;;  %1255 = vset.pattern.permute.xlu2 %v1461_v2  ;;  %v534_v32 = vand.u32 127, %v533_v22 }
  0x27   : > { %s1155_s11 = sshll.u32 %s1612_s5, 4  ;;  %s1138_s22 = sshll.u32 %s1612_s5, 2 }
  0x28   : > { %s461_s21 = scalar_lea.vmem %s1876_s0, %s1155_s11  ;;  %s466_s27 = scalar_lea.vmem %s1877_s1, %s1138_s22 }
  0x29   : > { %v482_v3 = vld [vmem:[%s461_s21] sm:$0xff]  ;;  %v483_v4 = vld [vmem:[%s461_s21 + $0x8] sm:$0xff]  ;;  %s1141_s28 = sshll.u32 %s1612_s5, 3  ;;  %s1743_s26 = scalar_lea.vmem %s1878_s2, %s1155_s11 }
  0x2a   : > { %519 = vperm.xlu1 %1253, %v482_v3   ;;  %490 = vperm.xlu0 %1251, %v482_v3   ;;  %v484_v8 = vld [vmem:[%s466_s27] sm:$0x7]  ;;  %s480_s18 = scalar_lea.vmem %s1879_s3, %s1141_s28  ;;  %s450_s11 = sand.u32 1, %s1436_s10  }
  0x2b   : > { %508 = vperm.xlu2 %1255, %v483_v4   ;;  %v511_v9 = vperm.slane %v484_v8, 1  ;;  %v498_v10 = vperm.slane %v484_v8, 0  ;;  %v526_v12 = vperm.slane %v484_v8, 2  ;;  %s1135_s21 = sshll.u32 %s450_s11, 4  ;;  %s1157_s22 = sshll.u32 %s1444_s12, 4 }
  0x2c   : > { %s452_s23 = scalar_lea.vmem [#allocation8], %s1135_s21  ;;  %s968_s28 = scalar_lea.hbm %s1885_s9, %s1157_s22 }
  0x2d   : > { %s969_s15 = sshll.u32 %s452_s23, 4  ;;  %s971_s16 = sshll.u32 %s968_s28, 4  ;;  %s970_s15 = int_to_ptr.vmem [resolvable:$true] %s969_s15  ;;  %s972_s16 = int_to_ptr.hbm [resolvable:$true] %s971_s16 }
  0x2e   : > { %s1380_s20 = sshra.s32 %s972_s16, 4  ;;  %s1381_s20 = int_to_ptr.hbm [resolvable:$true] %s1380_s20 }
  0x2f   : > { %s1382_s12 = scalar_lea.hbm %s1381_s20, 16  ;;  %p1387_p5 = scmp.lt.s32.totalorder %s1381_s20, %s1885_s9 }
  0x30   : > { %p1383_p1 = scmp.ne.s32.totalorder %s1381_s20, %s1382_s12  ;;  %p1388_p6 = scmp.lt.s32.totalorder %s1386_s29, %s1382_s12 }
  0x32   : > { %1254 = vset.pattern.permute.xlu1 %v1460_v1  ;;  %1252 = vset.pattern.permute.xlu0 %v1461_v2  ;;  %p1384_p2 = pnand %p1383_p1, %p1554_p4  ;;  %p1389_p7 = por %p1388_p6, %p1387_p5 }
  0x33   : > { %495 = vperm.xlu1 %1254, %v483_v4   ;;  %504 = vperm.xlu0 %1252, %v482_v3  }
  0x34   : > { %1256 = vset.pattern.permute.xlu2 %v1459_v0  ;;  %p1385_p3 = pneg %p1384_p2 }
  0x35   : > { %523 = vperm.xlu2 %1256, %v483_v4  }
  0x36   : > { %p1390_p9 = pnand %p1389_p7, %p1385_p3 }
  0x3b   : > { %1257 = vset.pattern.permute.xlu0 %v1459_v0 }
  0x85   : > { %v509_v5 = vpop.permute.xlu2 %508 }
  0x86   : > { %v513_v13 = vsub.f32 %v509_v5, %v511_v9 }
  0x88   : > { %v515_v19 = vmul.f32 %v513_v13, %v513_v13 }
  0x8f   : > { %v524_v11 = vpop.permute.xlu2 %523 }
  0x90   : > { %v528_v15 = vsub.f32 %v524_v11, %v526_v12 }
  0x92   : > { %v530_v26 = vmul.f32 %v528_v15, %v528_v15 }
  0x9c   : > { %v491_v6 = vpop.permute.xlu0 %490  ;;  %v520_v7 = vpop.permute.xlu1 %519 }
  0x9d   : > { %v499_v14 = vsub.f32 %v491_v6, %v498_v10  ;;  %v527_v18 = vsub.f32 %v520_v7, %v526_v12 }
  0x9f   : > { %v501_v23 = vmul.f32 %v499_v14, %v499_v14  ;;  %v529_v27 = vmul.f32 %v527_v18, %v527_v18 }
  0xa5   : > { %v496_v16 = vpop.permute.xlu1 %495  ;;  %v505_v17 = vpop.permute.xlu0 %504 }
  0xa6   : > { %v500_v20 = vsub.f32 %v496_v16, %v498_v10  ;;  %v512_v21 = vsub.f32 %v505_v17, %v511_v9 }
  0xa8   : > { %v502_v24 = vmul.f32 %v500_v20, %v500_v20  ;;  %v514_v25 = vmul.f32 %v512_v21, %v512_v21 }
  0xaa   : > { %v517_v28 = vadd.f32 %v515_v19, %v502_v24  ;;  %v516_v29 = vadd.f32 %v514_v25, %v501_v23 }
  0xac   : > { %v1624_v30 = vadd.f32 %v529_v27, %v516_v29  ;;  %v1626_v31 = vadd.f32 %v530_v26, %v517_v28 }
  0xae   : > { %v538_v33 = vand.u32 4294967288, %v1626_v31  ;;  %v537_v34 = vand.u32 4294967288, %v1624_v30 }
  0xb0   : > { %v1630_v35 = vor.u32 %v538_v33, %v534_v32  ;;  %v1632_v36 = vor.u32 %v537_v34, %v534_v32 }
  0xb2   : > { %v557_v37 = vsel %vm541_vm0, %v1630_v35, 2147483647  ;;  %v542_v38 = vsel %vm541_vm0, %v1632_v36, 2147483647 }
  0xb3   : > { %v559_v39 = vshra.s32 %v557_v37, 16  ;;  %v544_v40 = vshra.s32 %v542_v38, 16  ;;  %v558_v43 = vand.u32 65535, %v557_v37  ;;  %v543_v44 = vand.u32 65535, %v542_v38 }
  0xb5   : > { %v561_v41 = vcvt.s32.f32 %v559_v39  ;;  %v546_v42 = vcvt.s32.f32 %v544_v40  ;;  %v560_v47 = vcvt.s32.f32 %v558_v43  ;;  %v545_v48 = vcvt.s32.f32 %v543_v44 }
  0xb7   : > { %562 = vmin.xlane.f32.xlu2 %v561_v41  ;;  %547 = vmin.xlane.f32.xlu1 %v546_v42 }
 0x12a   : > { %v563_v45 = vpop.xlane.xlu2 %562  ;;  %v548_v46 = vpop.xlane.xlu1 %547 }
 0x12b   : > { %vm564_vm1 = vcmp.eq.f32.partialorder %v561_v41, %v563_v45  ;;  %vm549_vm2 = vcmp.eq.f32.partialorder %v546_v42, %v548_v46  ;;  %v569_v51 = vcvt.f32.s32 %v563_v45  ;;  %v554_v52 = vcvt.f32.s32 %v548_v46 }
 0x12c   : > { %v565_v49 = vsel %vm564_vm1, %v560_v47, inf  ;;  %v550_v50 = vsel %vm549_vm2, %v545_v48, inf }
 0x12d   : > { %566 = vmin.xlane.f32.xlu2 %v565_v49  ;;  %551 = vmin.xlane.f32.xlu0 %v550_v50  ;;  %v570_v55 = vshll.u32 %v569_v51, 16  ;;  %v555_v56 = vshll.u32 %v554_v52, 16 }
 0x1a0   : > { %v567_v53 = vpop.xlane.xlu2 %566  ;;  %v552_v54 = vpop.xlane.xlu0 %551 }
 0x1a1   : > { %v568_v57 = vcvt.f32.s32 %v567_v53  ;;  %v553_v58 = vcvt.f32.s32 %v552_v54 }
 0x1a3   : > { %v1638_v59 = vadd.s32 %v570_v55, %v568_v57  ;;  %v1640_v60 = vadd.s32 %v555_v56, %v553_v58 }
 0x1a5   : > { %vm573_vm3 = vcmp.eq.s32.totalorder %v1630_v35, %v1638_v59  ;;  %vm572_vm4 = vcmp.eq.s32.totalorder %v1632_v36, %v1640_v60 }
 0x1a6   : > { %v1650_v61 = vsel %vm573_vm3, 2147483647, %v1630_v35  ;;  %v1656_v62 = vsel %vm572_vm4, 2147483647, %v1632_v36  ;;  %v574_v33 = vsel %vm572_vm4, %v1624_v30, 0.0  ;;  %v575_v37 = vsel %vm573_vm3, %v1626_v31, 0.0 }
 0x1a7   : > { %v637_v63 = vsel %vm541_vm0, %v1650_v61, 2147483647  ;;  %v622_v0 = vsel %vm541_vm0, %v1656_v62, 2147483647  ;;  %v576_v34 = vsel %vm541_vm0, %v574_v33, 0.0  ;;  %v579_v38 = vsel %vm541_vm0, %v575_v37, 0.0 }
 0x1a8   : > { %v639_v1 = vshra.s32 %v637_v63, 16  ;;  %v624_v2 = vshra.s32 %v622_v0, 16  ;;  %v638_v5 = vand.u32 65535, %v637_v63  ;;  %v623_v6 = vand.u32 65535, %v622_v0 }
 0x1aa   : > { %v641_v3 = vcvt.s32.f32 %v639_v1  ;;  %v626_v4 = vcvt.s32.f32 %v624_v2  ;;  %v640_v9 = vcvt.s32.f32 %v638_v5  ;;  %v625_v10 = vcvt.s32.f32 %v623_v6 }
 0x1ac   : > { %642 = vmin.xlane.f32.xlu2 %v641_v3  ;;  %627 = vmin.xlane.f32.xlu1 %v626_v4 }
 0x21f   : > { %v643_v7 = vpop.xlane.xlu2 %642  ;;  %v628_v8 = vpop.xlane.xlu1 %627 }
 0x220   : > { %vm644_vm5 = vcmp.eq.f32.partialorder %v641_v3, %v643_v7  ;;  %vm629_vm6 = vcmp.eq.f32.partialorder %v626_v4, %v628_v8  ;;  %v649_v13 = vcvt.f32.s32 %v643_v7  ;;  %v634_v14 = vcvt.f32.s32 %v628_v8 }
 0x221   : > { %v645_v11 = vsel %vm644_vm5, %v640_v9, inf  ;;  %v630_v12 = vsel %vm629_vm6, %v625_v10, inf }
 0x222   : > { %646 = vmin.xlane.f32.xlu1 %v645_v11  ;;  %631 = vmin.xlane.f32.xlu0 %v630_v12  ;;  %v650_v17 = vshll.u32 %v649_v13, 16  ;;  %v635_v18 = vshll.u32 %v634_v14, 16 }
 0x295   : > { %v647_v15 = vpop.xlane.xlu1 %646  ;;  %v632_v16 = vpop.xlane.xlu0 %631 }
 0x296   : > { %v648_v19 = vcvt.f32.s32 %v647_v15  ;;  %v633_v20 = vcvt.f32.s32 %v632_v16 }
 0x298   : > { %v1662_v21 = vadd.s32 %v650_v17, %v648_v19  ;;  %v1664_v22 = vadd.s32 %v635_v18, %v633_v20  ;;  %v842_v19 = vld [vmem:[#allocation2 + $0x8] sm:$0xff]  ;;  %v841_v20 = vld [vmem:[#allocation2] sm:$0xff] }
 0x299   : > { %896 = vmatpush.msra.mxu2 %v842_v19 }
 0x29a   : > { %vm653_vm7 = vcmp.eq.s32.totalorder %v1650_v61, %v1662_v21  ;;  %vm652_vm8 = vcmp.eq.s32.totalorder %v1656_v62, %v1664_v22 }
 0x29b   : > { %v1674_v23 = vsel %vm653_vm7, 2147483647, %v1650_v61  ;;  %v1680_v24 = vsel %vm652_vm8, 2147483647, %v1656_v62  ;;  %v654_v47 = vsel %vm652_vm8, %v1624_v30, 0.0  ;;  %v655_v49 = vsel %vm653_vm7, %v1626_v31, 0.0  ;;  %897 = vmatpush.msra.mxu2 %v841_v20 }
 0x29c   : > { %v717_v25 = vsel %vm541_vm0, %v1674_v23, 2147483647  ;;  %v702_v26 = vsel %vm541_vm0, %v1680_v24, 2147483647  ;;  %v656_v48 = vsel %vm541_vm0, %v654_v47, 0.0  ;;  %v659_v50 = vsel %vm541_vm0, %v655_v49, 0.0 }
 0x29d   : > { %v719_v27 = vshra.s32 %v717_v25, 16  ;;  %v704_v28 = vshra.s32 %v702_v26, 16  ;;  %v703_v39 = vand.u32 65535, %v702_v26  ;;  %v718_v40 = vand.u32 65535, %v717_v25 }
 0x29f   : > { %v721_v29 = vcvt.s32.f32 %v719_v27  ;;  %v706_v32 = vcvt.s32.f32 %v704_v28  ;;  %v705_v43 = vcvt.s32.f32 %v703_v39  ;;  %v720_v44 = vcvt.s32.f32 %v718_v40  ;;  %v485_v27 = vld [vmem:[%s1743_s26] sm:$0xff] }
 0x2a0   : > { %1146 = vmatmul.msk.f32.vlgmr.msra.gmra.mxu2 %vm846_vm13, %v485_v27 }
 0x2a1   : > { %722 = vmin.xlane.f32.xlu0 %v721_v29  ;;  %707 = vmin.xlane.f32.xlu2 %v706_v32 }
 0x2a9   : > { %577 = vadd.xlane.f32.xlu0 %v576_v34 }
 0x2b1   : > { %580 = vadd.xlane.f32.xlu0 %v579_v38 }
 0x314   : > { %v708_v41 = vpop.xlane.xlu2 %707  ;;  %v723_v42 = vpop.xlane.xlu0 %722 }
 0x315   : > { %vm709_vm9 = vcmp.eq.f32.partialorder %v706_v32, %v708_v41  ;;  %vm724_vm10 = vcmp.eq.f32.partialorder %v721_v29, %v723_v42  ;;  %v714_v51 = vcvt.f32.s32 %v708_v41  ;;  %v729_v52 = vcvt.f32.s32 %v723_v42 }
 0x316   : > { %v710_v45 = vsel %vm709_vm9, %v705_v43, inf  ;;  %v725_v46 = vsel %vm724_vm10, %v720_v44, inf }
 0x317   : > { %711 = vmin.xlane.f32.xlu1 %v710_v45  ;;  %726 = vmin.xlane.f32.xlu2 %v725_v46  ;;  %v715_v55 = vshll.u32 %v714_v51, 16  ;;  %v730_v58 = vshll.u32 %v729_v52, 16  ;;  %v843_v45 = vld [vmem:[#allocation5] sm:$0xff] }
 0x31c   : > { %v578_v6 = vpop.xlane.xlu0 %577 }
 0x31d   : > { %v582_v7 = vadd.f32 1e-08, %v578_v6 }
 0x31f   : > { %657 = vadd.xlane.f32.xlu1 %v656_v48  ;;  %1260 = vrcp.f32 %v582_v7  ;;  %v593_v37 = vand.u32 2147483647, %v582_v7  ;;  %vm589_vm1 = vweird.f32 %v582_v7  ;;  %v595_v42 = vand.u32 2147483648, %v582_v7 }
 0x321   : > { %vm594_vm6 = vcmp.eq.f32.partialorder %v593_v37, 8.507059e+37 }
 0x324   : > { %v581_v9 = vpop.xlane.xlu0 %580 }
 0x325   : > { %v1261_v11 = vpop.eup %1260  ;;  %v1733_v12 = vadd.f32 1e-08, %v581_v9  ;;  %v914_v9 = vld [vmem:[#allocation7 + $0x10] sm:$0xff] }
 0x326   : > { %v585_v14 = vmul.f32 %v1261_v11, %v582_v7  ;;  %vm590_vm14 = vweird.f32 %v1261_v11 }
 0x327   : > { %660 = vadd.xlane.f32.xlu1 %v659_v50  ;;  %vm1760_vm5 = vmor %vm589_vm1, %vm590_vm14  ;;  %vm604_vm10 = vweird.f32 %v1733_v12  ;;  %v608_v62 = vand.u32 2147483647, %v1733_v12 }
 0x328   : > { %v586_v16 = vsub.f32 1.0, %v585_v14 }
 0x32a   : > { %v587_v29 = vmul.f32 %v1261_v11, %v586_v16 }
 0x32c   : > { %v588_v39 = vadd.f32 %v1261_v11, %v587_v29 }
 0x32e   : > { %v592_v51 = vsel %vm1760_vm5, %v1261_v11, %v588_v39 }
 0x38a   : > { %v712_v53 = vpop.xlane.xlu1 %711  ;;  %v727_v54 = vpop.xlane.xlu2 %726 }
 0x38b   : > { %v713_v56 = vcvt.f32.s32 %v712_v53  ;;  %v728_v57 = vcvt.f32.s32 %v727_v54  ;;  %v596_v54 = vor.u32 1.1754944e-38, %v595_v42 }
 0x38d   : > { %v1706_v63 = vadd.s32 %v715_v55, %v713_v56  ;;  %v1708_v0 = vadd.s32 %v730_v58, %v728_v57  ;;  %v610_v56 = vand.u32 2147483648, %v1733_v12  ;;  %v597_v58 = vsel %vm594_vm6, %v596_v54, %v592_v51 }
 0x38f   : > { %vm732_vm11 = vcmp.eq.s32.totalorder %v1680_v24, %v1706_v63  ;;  %vm733_vm12 = vcmp.eq.s32.totalorder %v1674_v23, %v1708_v0  ;;  %v611_v29 = vor.u32 1.1754944e-38, %v610_v56 }
 0x390   : > { %v734_v1 = vsel %vm732_vm11, %v1624_v30, 0.0  ;;  %v735_v3 = vsel %vm733_vm12, %v1626_v31, 0.0  ;;  %v487_v31 = vld [vmem:[%s480_s18] sm:$0xff]  ;;  %s955_s18 = scalar_lea.sflag [#allocation4], %s450_s11 }
 0x391   : > { %v736_v2 = vsel %vm541_vm0, %v734_v1, 0.0  ;;  %v739_v4 = vsel %vm541_vm0, %v735_v3, 0.0  ;;  %801 = vmatpush.msra.mxu0 %v487_v31 }
 0x392   : > { %737 = vadd.xlane.f32.xlu2 %v736_v2  ;;  %v658_v5 = vpop.xlane.xlu1 %657 }
 0x393   : > { %v1724_v8 = vadd.f32 1e-08, %v658_v5 }
 0x395   : > { %1262 = vrcp.f32 %v1724_v8  ;;  %v675_v43 = vand.u32 2147483648, %v1724_v8  ;;  %vm669_vm2 = vweird.f32 %v1724_v8  ;;  %v673_v46 = vand.u32 2147483647, %v1724_v8 }
 0x397   : > { %v676_v55 = vor.u32 1.1754944e-38, %v675_v43  ;;  %vm674_vm14 = vcmp.eq.f32.partialorder %v673_v46, 8.507059e+37  ;;  %v486_v46 = vld [vmem:[%s1743_s26 + $0x8] sm:$0xff] }
 0x398   : > { %1147 = vmatmul.msk.f32.gmra.mxu2 %vm846_vm13, %v486_v46 }
 0x39a   : > { %740 = vadd.xlane.f32.xlu2 %v739_v4  ;;  %v661_v30 = vpop.xlane.xlu1 %660 }
 0x39b   : > { %v1731_v10 = vadd.f32 1e-08, %v661_v30  ;;  %v1263_v13 = vpop.eup %1262 }
 0x39c   : > { %v665_v15 = vmul.f32 %v1263_v13, %v1724_v8  ;;  %vm670_vm15 = vweird.f32 %v1263_v13 }
 0x39d   : > { %1264 = vrcp.f32 %v1731_v10  ;;  %vm671_vm9 = vmor %vm669_vm2, %vm670_vm15  ;;  %vm684_vm2 = vweird.f32 %v1731_v10  ;;  %v690_v6 = vand.u32 2147483648, %v1731_v10  ;;  %v688_v31 = vand.u32 2147483647, %v1731_v10 }
 0x39e   : > { %1266 = vrcp.f32 %v1733_v12  ;;  %v666_v17 = vsub.f32 1.0, %v665_v15 }
 0x39f   : > { %v691_v20 = vor.u32 1.1754944e-38, %v690_v6 }
 0x3a0   : > { %v667_v32 = vmul.f32 %v1263_v13, %v666_v17 }
 0x3a2   : > { %v668_v40 = vadd.f32 %v1263_v13, %v667_v32 }
 0x3a3   : > { %v1745_v18 = vpop.eup %1264 }
 0x3a4   : > { %v1747_v25 = vpop.eup %1266  ;;  %v680_v33 = vmul.f32 %v1745_v18, %v1731_v10  ;;  %v672_v52 = vsel %vm671_vm9, %v1263_v13, %v668_v40  ;;  %vm685_vm15 = vweird.f32 %v1745_v18  ;;  %v614_v13 = vsel %vm572_vm4, %v597_v58, 0.0 }
 0x3a5   : > { %v600_v34 = vmul.f32 %v1747_v25, %v1733_v12  ;;  %v677_v1 = vsel %vm674_vm14, %v676_v55, %v672_v52  ;;  %vm605_vm5 = vweird.f32 %v1747_v25  ;;  %vm1787_vm9 = vmor %vm684_vm2, %vm685_vm15  ;;  %vm689_vm4 = vcmp.eq.f32.partialorder %v688_v31, 8.507059e+37  ;;  %v913_v31 = vld [vmem:[#allocation7 + $0x8] sm:$0xff] }
 0x3a6   : > { %v681_v38 = vsub.f32 1.0, %v680_v33  ;;  %v694_v8 = vsel %vm652_vm8, %v677_v1, 0.0  ;;  %v698_v14 = vadd.f32 %v677_v1, %v597_v58  ;;  %vm1802_vm15 = vmor %vm604_vm10, %vm605_vm5  ;;  %vm609_vm10 = vcmp.eq.f32.partialorder %v608_v62, 8.507059e+37 }
 0x3a7   : > { %v601_v41 = vsub.f32 1.0, %v600_v34  ;;  %v696_v60 = vadd.f32 %v694_v8, %v614_v13  ;;  %v899_v13 = vpop.f32.mrf.mxu2 }
 0x3a8   : > { %v682_v49 = vmul.f32 %v1745_v18, %v681_v38 }
 0x3a9   : > { %v602_v53 = vmul.f32 %v1747_v25, %v601_v41 }
 0x3aa   : > { %v683_v5 = vadd.f32 %v1745_v18, %v682_v49 }
 0x3ab   : > { %v603_v7 = vadd.f32 %v1747_v25, %v602_v53 }
 0x3ac   : > { %v687_v36 = vsel %vm1787_vm9, %v1745_v18, %v683_v5 }
 0x3ad   : > { %v607_v19 = vsel %vm1802_vm15, %v1747_v25, %v603_v7  ;;  %v692_v32 = vsel %vm689_vm4, %v691_v20, %v687_v36  ;;  %vm920_vm15 = vcmask 261120   ;;  %v1259_v20 = vld [vmem:[%s1884_s8] ss:$0 sm:$0xff] }
 0x3ae   : > { %v612_v25 = vsel %vm609_vm10, %v611_v29, %v607_v19  ;;  %v695_v24 = vsel %vm653_vm7, %v692_v32, 0.0 }
 0x3af   : > { %v615_v38 = vsel %vm573_vm3, %v612_v25, 0.0  ;;  %v699_v39 = vadd.f32 %v692_v32, %v612_v25 }
 0x3b0   : > { %v697_v41 = vadd.f32 %v695_v24, %v615_v38 }
 0x405   : > { %v738_v26 = vpop.xlane.xlu2 %737 }
 0x406   : > { %v1750_v28 = vadd.f32 1e-08, %v738_v26 }
 0x408   : > { %1268 = vrcp.f32 %v1750_v28  ;;  %v755_v2 = vand.u32 2147483648, %v1750_v28  ;;  %v753_v4 = vand.u32 2147483647, %v1750_v28  ;;  %vm749_vm6 = vweird.f32 %v1750_v28 }
 0x40a   : > { %v756_v15 = vor.u32 1.1754944e-38, %v755_v2  ;;  %vm754_vm8 = vcmp.eq.f32.partialorder %v753_v4, 8.507059e+37 }
 0x40d   : > { %v741_v44 = vpop.xlane.xlu2 %740 }
 0x40e   : > { %v1269_v47 = vpop.eup %1268  ;;  %v1765_v48 = vadd.f32 1e-08, %v741_v44  ;;  %v844_v44 = vld [vmem:[#allocation5 + $0x8] sm:$0xff] }
 0x40f   : > { %v745_v50 = vmul.f32 %v1269_v47, %v1750_v28  ;;  %vm750_vm1 = vweird.f32 %v1269_v47  ;;  %867 = vmatpush.msra.mxu1 %v844_v44 }
 0x410   : > { %1270 = vrcp.f32 %v1765_v48  ;;  %vm751_vm14 = vmor %vm749_vm6, %vm750_vm1  ;;  %v770_v33 = vand.u32 2147483648, %v1765_v48  ;;  %v768_v34 = vand.u32 2147483647, %v1765_v48 }
 0x411   : > { %v746_v57 = vsub.f32 1.0, %v745_v50  ;;  %868 = vmatpush.msra.mxu1 %v843_v45 }
 0x412   : > { %v771_v37 = vor.u32 1.1754944e-38, %v770_v33  ;;  %vm769_vm5 = vcmp.eq.f32.partialorder %v768_v34, 8.507059e+37 }
 0x413   : > { %v747_v3 = vmul.f32 %v1269_v47, %v746_v57 }
 0x415   : > { %v748_v30 = vadd.f32 %v1269_v47, %v747_v3 }
 0x416   : > { %v1271_v11 = vpop.eup %1270 }
 0x417   : > { %v760_v22 = vmul.f32 %v1271_v11, %v1765_v48  ;;  %v752_v16 = vsel %vm751_vm14, %v1269_v47, %v748_v30  ;;  %vm765_vm1 = vweird.f32 %v1271_v11  ;;  %v915_v30 = vld [vmem:[#allocation7 + $0x18] sm:$0xff] }
 0x418   : > { %v757_v17 = vsel %vm754_vm8, %v756_v15, %v752_v16  ;;  %939 = vmatpush.msra.mxu3 %v915_v30 }
 0x419   : > { %v761_v26 = vsub.f32 1.0, %v760_v22  ;;  %v774_v12 = vsel %vm732_vm11, %v757_v17, 0.0  ;;  %v778_v27 = vadd.f32 %v757_v17, %v698_v14  ;;  %vm764_vm11 = vweird.f32 %v1765_v48  ;;  %v1258_v14 = vld [vmem:[%s1882_s6] ss:$0 sm:$0xff] }
 0x41a   : > { %v776_v28 = vadd.f32 %v774_v12, %v696_v60  ;;  %vm766_vm2 = vmor %vm764_vm11, %vm765_vm1  ;;  %940 = vmatpush.msra.mxu3 %v914_v9 }
 0x41b   : > { %v762_v18 = vmul.f32 %v1271_v11, %v761_v26  ;;  %1272 = vrcp.f32 %v778_v27  ;;  %v820_v51 = vand.u32 2147483648, %v778_v27  ;;  %v818_v52 = vand.u32 2147483647, %v778_v27  ;;  %v902_v10 = vpop.f32.mrf.mxu2 }
 0x41c   : > { %1142 = vmatmul.msk.f32.vlgmr.msra.gmra.mxu0 %vm541_vm0, %v776_v28  ;;  %941 = vmatpush.msra.mxu3 %v913_v31 }
 0x41d   : > { %v763_v63 = vadd.f32 %v1271_v11, %v762_v18  ;;  %v821_v55 = vor.u32 1.1754944e-38, %v820_v51 }
 0x41f   : > { %v767_v40 = vsel %vm766_vm2, %v1271_v11, %v763_v63  ;;  %v912_v11 = vld [vmem:[#allocation7] sm:$0xff] }
 0x420   : > { %v772_v42 = vsel %vm769_vm5, %v771_v37, %v767_v40  ;;  %942 = vmatpush.msra.mxu3 %v912_v11 }
 0x421   : > { %v775_v61 = vsel %vm733_vm12, %v772_v42, 0.0  ;;  %v779_v21 = vadd.f32 %v772_v42, %v699_v39  ;;  %v1273_v35 = vpop.eup %1272  ;;  %vm819_vm12 = vcmp.eq.f32.partialorder %v818_v52, 8.507059e+37 }
 0x422   : > { %v777_v43 = vadd.f32 %v775_v61, %v697_v41  ;;  %v810_v59 = vmul.f32 %v1273_v35, %v778_v27  ;;  %vm815_vm3 = vweird.f32 %v1273_v35 }
 0x423   : > { %1274 = vrcp.f32 %v779_v21  ;;  %v835_v2 = vand.u32 2147483648, %v779_v21  ;;  %vm829_vm9 = vweird.f32 %v779_v21  ;;  %v833_v3 = vand.u32 2147483647, %v779_v21 }
 0x424   : > { %1143 = vmatmul.msk.f32.gmra.mxu0 %vm541_vm0, %v777_v43  ;;  %v811_v47 = vsub.f32 1.0, %v810_v59  ;;  %vm814_vm0 = vweird.f32 %v778_v27 }
 0x425   : > { %vm816_vm7 = vmor %vm814_vm0, %vm815_vm3  ;;  %v836_v5 = vor.u32 1.1754944e-38, %v835_v2  ;;  %vm834_vm8 = vcmp.eq.f32.partialorder %v833_v3, 8.507059e+37 }
 0x426   : > { %v812_v49 = vmul.f32 %v1273_v35, %v811_v47 }
 0x428   : > { %v813_v0 = vadd.f32 %v1273_v35, %v812_v49 }
 0x429   : > { %v1275_v48 = vpop.eup %1274 }
 0x42a   : > { %v825_v23 = vmul.f32 %v1275_v48, %v779_v21  ;;  %v817_v53 = vsel %vm816_vm7, %v1273_v35, %v813_v0  ;;  %vm830_vm6 = vweird.f32 %v1275_v48 }
 0x42b   : > { %v822_v57 = vsel %vm819_vm12, %v821_v55, %v817_v53  ;;  %vm831_vm14 = vmor %vm829_vm9, %vm830_vm6 }
 0x42c   : > { %v826_v50 = vsub.f32 1.0, %v825_v23 }
 0x42e   : > { %v827_v54 = vmul.f32 %v1275_v48, %v826_v50 }
 0x430   : > { %v828_v1 = vadd.f32 %v1275_v48, %v827_v54 }
 0x432   : > { %v832_v4 = vsel %vm831_vm14, %v1275_v48, %v828_v1 }
 0x433   : > { %v837_v7 = vsel %vm834_vm8, %v836_v5, %v832_v4 }
 0x499   : > { %v803_v56 = vpop.f32.mrf.mxu0 }
 0x49a   : > { %v839_v58 = vmul.f32 %v822_v57, %v803_v56 }
 0x49c   : > { %1144 = vmatmul.msk.f32.vlgmr.msra.gmra.mxu1 %vm846_vm13, %v839_v58 }
 0x4a1   : > { %v806_v6 = vpop.f32.mrf.mxu0 }
 0x4a2   : > { %v840_v8 = vmul.f32 %v837_v7, %v806_v6 }
 0x4a4   : > { %1145 = vmatmul.msk.f32.gmra.mxu1 %vm846_vm13, %v840_v8 }
 0x519   : > { %v870_v15 = vpop.f32.mrf.mxu1 }
 0x51a   : > { %v900_v62 = vadd.f32 %v899_v13, %v870_v15 }
 0x51c   : > { %v908_v22 = vadd.f32 %v1258_v14, %v900_v62 }
 0x51e   : > { %v910_v16 = vmax.f32 %v908_v22, 0.0 }
 0x520   : > { %1148 = vmatmul.msk.f32.vlgmr.msra.gmra.mxu3 %vm920_vm15, %v910_v16 }
 0x521   : > { %v873_v36 = vpop.f32.mrf.mxu1 }
 0x522   : > { %v903_v60 = vadd.f32 %v902_v10, %v873_v36 }
 0x524   : > { %v909_v17 = vadd.f32 %v1258_v14, %v903_v60 }
 0x526   : > { %v911_v19 = vmax.f32 %v909_v17, 0.0 }
 0x528   : > { %1149 = vmatmul.msk.f32.gmra.mxu3 %vm920_vm15, %v911_v19 }
 0x5a3   : > { %v944_v26 = vpop.f32.mrf.mxu3 }
 0x5a4   : > { %v945_v12 = vadd.f32 %v1259_v20, %v944_v26 }
 0x5a6   : > { %v950_v27 = vmax.f32 %v945_v12, 0.0 }
 0x5a8   : > { %952 = vst [vmem:[%s452_s23] sm:$0xff] %v950_v27 }
 0x5ab   : > { %v947_v28 = vpop.f32.mrf.mxu3 }
 0x5ac   : > { %v948_v29 = vadd.f32 %v1259_v20, %v947_v28 }
 0x5ae   : > { %v951_v32 = vmax.f32 %v948_v29, 0.0 }
 0x5b0   : > { %953 = vst [vmem:[%s452_s23 + $0x8] sm:$0xff] %v951_v32 }
 0x5b1   : > { %1393 = shalt.err (!%p1390_p9)
}
 0x5b2   : > { %s1462_s11 = smov 128   ;;  %s1463_s17 = smov 8  }
 0x5b3   : > { %1170 = dma.vmem_to_hbm [thread:$0]  (%p1554_p4), %s970_s15, 256, %s972_s16, %s955_s18, %s1462_s11, %s1462_s11, %s1463_s17  }
 0x5b4 PF: > { %p1192_p10 = scmp.ge.s32.totalorder %s1452_s14, 2  ;;  %s986_s22 = sand.u32 1, %s1432_s30  }
 0x5b5   : > { %s987_s23 = scalar_lea.sflag [#allocation4], %s986_s22 }
 0x5b6   : > { %p1183_p11 = pnand %p1192_p10, %p1561_p8 }
 0x5b8   : > { %p1184_p12 = pneg %p1183_p11 }
 0x5ba   : > { %1427 = dma.done.wait (%p1184_p12), %s987_s23, 256  }
 0x5bb   : > { %1429 = vsyncadd (%p1184_p12), %s987_s23, 4294967040  ;;  %s24_s14 = sadd.s32 1, %s1452_s14   ;;  %s1909_s24 = sld [smem:[#allocation12_spill]] }
 0x5bc   : > { %p21_p13 = scmp.ge.s32.totalorder %s24_s14, 4   ;;  %s1910_s11 = sld [smem:[#allocation16_spill]] }
 0x5bd   : > { %s1911_s12 = sld [smem:[#allocation13_spill]]  ;;  %s1913_s30 = smov %s1436_s10 }
 0x5be   : > { %s1912_s13 = sld [smem:[#allocation14_spill]]  ;;  %23 = sbr.rel (!%p21_p13) target bundleno = 8 (0x8), region = 113 }
 0x5c1   : > { %s1914_s10 = smov %s1909_s24 }
 0x5c3   :  { %993 = vsyncpa [#allocation3], 1 }
 0x5c4   :  { %995 = vsyncpa [#allocation3 + $0x1], 1 }
 0x5c5   :  { %996 = vsyncpa [#allocation6], 1 }
 0x5c6   :  { %997 = vsyncpa [#allocation4], 1 }
 0x5c7   :  { %999 = vsyncpa [#allocation4 + $0x1], 1 }

</bundles_post_ra>
